<compile_context>
chip_gen: v6e
topology: v6e:2x2x1
jax: 0.10.0
libtpu: 0.0.40
codegen_flags: <defaults>
</compile_context>

<pallas_src>
import jax
import jax.numpy as jnp
import numpy as np
from jax.experimental import pallas as pl
from jax.experimental.pallas import tpu as pltpu

# ----- model hyperparameters (module defaults) -----
FEAT_SIZE = 6
NUM_CONTINUOUS = 2
NUM_DISCRETE = FEAT_SIZE - NUM_CONTINUOUS     # 4
EMB = 4                                       # embedding_size
HIDDEN = (64, 32)                             # hidden_dims
DNN_IN = FEAT_SIZE * EMB                      # 24
OUT_DIM = 1 + HIDDEN[-1]                      # 33

# fused-slab column layout (8-aligned boundaries, padded to a full 128-lane vreg)
F_PAD = 8                                     # feature axis padded 6 -> 8
COL_DNN = 0                                   # [0:24)   dnn_in
COL_SUM = DNN_IN                              # [24:28)  sum_e
COL_FM = COL_SUM + EMB                        # [28]     fm_first
COL_H1 = 32                                   # [32:96)  h1 pre-activation
FUSED_OUT = 128                               # padded slab width


def _round_up(n, m):
    return ((n + m - 1) // m) * m


# --------------------------------------------------------------------------------------
# Kernel: one batch tile. Two MXU passes, f32 accumulation, one merged 33-wide store.
# --------------------------------------------------------------------------------------
def deepfm_kernel(x_ref, wf_ref, bf_ref, w2_ref, b2_ref, out_ref):
    # Fused affine: embeddings + cont_linear + fm_linear + field-sum + first DNN layer.
    z = jnp.dot(x_ref[...], wf_ref[...],
                preferred_element_type=jnp.float32) + bf_ref[...]          # [TB, 128] f32

    dnn_in = z[:, COL_DNN:COL_DNN + DNN_IN]                                # [TB, 24]
    sum_e = z[:, COL_SUM:COL_SUM + EMB]                                    # [TB, 4]
    fm_first = z[:, COL_FM:COL_FM + 1]                                     # [TB, 1]
    h1 = jnp.maximum(z[:, COL_H1:COL_H1 + HIDDEN[0]], 0.0)                 # [TB, 64]

    # FM second order: sum_{i<j} <e_i, e_j> = 0.5 * (||sum_e||^2 - sum_i ||e_i||^2). f32.
    fm_second = 0.5 * (jnp.sum(sum_e * sum_e, axis=1, keepdims=True)
                       - jnp.sum(dnn_in * dnn_in, axis=1, keepdims=True))  # [TB, 1]

    # Second DNN layer.
    h2 = jnp.maximum(
        jnp.dot(h1.astype(w2_ref.dtype), w2_ref[...],
                preferred_element_type=jnp.float32) + b2_ref[...], 0.0)    # [TB, 32]

    # Single merged output block: [fm_first + fm_second | h2] -> one store per tile.
    out_ref[...] = jnp.concatenate([fm_first + fm_second, h2],
                                   axis=1).astype(out_ref.dtype)


# --------------------------------------------------------------------------------------
# Host-side fused weight construction (done once, outside the kernel).
# --------------------------------------------------------------------------------------
def build_fused_params(p):
    """Fold embeddings / cont_linear / fm_linear / field-sum / first DNN layer into
    one [F_PAD, FUSED_OUT] matrix + [1, FUSED_OUT] bias."""
    # x -> dnn_in affine (e_i = t0[i] + x_i*(t1[i]-t0[i]) for discrete, cont_linear for cont).
    Wd = np.zeros((F_PAD, DNN_IN), np.float32)
    bd = np.zeros((DNN_IN,), np.float32)
    t0 = np.asarray(p["t0"])
    diff = np.asarray(p["t1"]) - t0                          # [ND, E]
    for i in range(NUM_DISCRETE):
        Wd[i, i * EMB:(i + 1) * EMB] = diff[i]
        bd[i * EMB:(i + 1) * EMB] = t0[i]
    Wd[NUM_DISCRETE:FEAT_SIZE, NUM_DISCRETE * EMB:] = np.asarray(p["cw"])
    bd[NUM_DISCRETE * EMB:] = np.asarray(p["cb"]).reshape(-1)

    # Selector S[f*E+e, e] = 1: dnn_in @ S == sum_f e_f (per embedding dim).
    S = np.zeros((DNN_IN, EMB), np.float32)
    for f in range(FEAT_SIZE):
        for e in range(EMB):
            S[f * EMB + e, e] = 1.0

    w1 = np.asarray(p["w1"])                                 # [24, 64]
    b1 = np.asarray(p["b1"]).reshape(-1)                     # [64]
    fmw = np.zeros((F_PAD, 1), np.float32)
    fmw[:FEAT_SIZE] = np.asarray(p["fmw"])
    fmb = float(np.asarray(p["fmb"]).reshape(-1)[0])

    W = np.zeros((F_PAD, FUSED_OUT), np.float32)
    b = np.zeros((FUSED_OUT,), np.float32)
    W[:, COL_DNN:COL_DNN + DNN_IN] = Wd
    b[COL_DNN:COL_DNN + DNN_IN] = bd
    W[:, COL_SUM:COL_SUM + EMB] = Wd @ S
    b[COL_SUM:COL_SUM + EMB] = bd @ S
    W[:, COL_FM:COL_FM + 1] = fmw
    b[COL_FM] = fmb
    W[:, COL_H1:COL_H1 + HIDDEN[0]] = Wd @ w1                # first DNN layer folded in
    b[COL_H1:COL_H1 + HIDDEN[0]] = bd @ w1 + b1
    return jnp.asarray(W), jnp.asarray(b).reshape(1, FUSED_OUT)


def _choose_tile(B, tile_b):
    b128 = _round_up(B, 128)
    tb = max(128, min(_round_up(tile_b, 128), b128))
    # Prefer >= 2 grid steps so the "parallel" batch axis can use both v7x TensorCores.
    if b128 // tb < 2 and b128 >= 256:
        tb = _round_up(pl.cdiv(b128, 2), 128)
    return tb


# --------------------------------------------------------------------------------------
# Wrapper: batch-tiled pallas_call with a single merged [B, 33] output.
# --------------------------------------------------------------------------------------
def deepfm_forward(x, params, *, tile_b=2048, matmul_dtype=jnp.float32,
                   out_dtype=jnp.float32):
    B = x.shape[0]
    wf, bf = build_fused_params(params)
    wf = wf.astype(matmul_dtype)
    w2 = params["w2"].astype(matmul_dtype)
    b2 = params["b2"]

    tile_b = _choose_tile(B, tile_b)
    b_pad = _round_up(B, tile_b)

    # Pad batch to a tile multiple and feature axis 6 -> 8; cast x so the DMA carries
    # the matmul dtype (bf16 halves read traffic on v6e/v7x).
    x = jnp.pad(x, ((0, b_pad - B), (0, F_PAD - FEAT_SIZE))).astype(matmul_dtype)
    grid = (pl.cdiv(b_pad, tile_b),)

    batch_map = lambda i: (i, 0)
    const_map = lambda i: (0, 0)

    in_specs = [
        pl.BlockSpec((tile_b, F_PAD), batch_map),   # x: tiled over batch
        pl.BlockSpec(wf.shape, const_map),          # fused weights (grid-invariant)
        pl.BlockSpec(bf.shape, const_map),
        pl.BlockSpec(w2.shape, const_map),
        pl.BlockSpec(b2.shape, const_map),
    ]
    out_specs = pl.BlockSpec((tile_b, OUT_DIM), batch_map)
    out_shape = jax.ShapeDtypeStruct((b_pad, OUT_DIM), out_dtype)

    # Advisory cost estimate so XLA can overlap this small call with surrounding ops.
    x_bytes = jnp.dtype(matmul_dtype).itemsize
    o_bytes = jnp.dtype(out_dtype).itemsize
    cost = pl.CostEstimate(
        flops=2 * b_pad * (F_PAD * FUSED_OUT + HIDDEN[0] * HIDDEN[1]),
        transcendentals=0,
        bytes_accessed=b_pad * (F_PAD * x_bytes + OUT_DIM * o_bytes)
        + wf.size * x_bytes + w2.size * x_bytes + bf.size * 4 + b2.size * 4,
    )

    # Large tiles overshoot v5e's 16 MiB default scoped VMEM; raise the limit explicitly.
    vmem_limit = None
    per_tile = tile_b * 128 * (2 * x_bytes + 2 * o_bytes + 8 * 4)   # rough, lane-padded
    if per_tile > (12 << 20):
        vmem_limit = min(int(per_tile * 2), 56 << 20)               # fits v7x's 64 MiB too

    out = pl.pallas_call(
        deepfm_kernel,
        grid=grid,
        in_specs=in_specs,
        out_specs=out_specs,
        out_shape=out_shape,
        cost_estimate=cost,
        compiler_params=pltpu.CompilerParams(
            dimension_semantics=("parallel",),      # shards batch across v7x's 2 TCs
            vmem_limit_bytes=vmem_limit),
    )(x, wf, bf, w2, b2)

    # Padded tail rows (if any) contain garbage -> trim. No host-side concat anymore.
    return out[:B] if b_pad != B else out


# --------------------------------------------------------------------------------------
# Pure-JAX reference mirroring the PyTorch forward exactly.
# --------------------------------------------------------------------------------------
def deepfm_reference(x, p):
    disc = x[:, :NUM_DISCRETE]
    cont = x[:, NUM_DISCRETE:]
    idx = disc.astype(jnp.int32)                                       # values in {0,1}
    disc_embeds = jnp.stack(
        [jnp.where((idx[:, i:i + 1] == 1), p["t1"][i][None, :], p["t0"][i][None, :])
         for i in range(NUM_DISCRETE)], axis=1)                        # [B, ND, E]
    cont_embeds = (cont @ p["cw"] + p["cb"]).reshape(-1, NUM_CONTINUOUS, EMB)
    all_e = jnp.concatenate([disc_embeds, cont_embeds], axis=1)        # [B, F, E]
    fm_first = x @ p["fmw"] + p["fmb"]
    terms = []
    F = all_e.shape[1]
    for i in range(F):
        for j in range(i + 1, F):
            terms.append(jnp.sum(all_e[:, i] * all_e[:, j], axis=1, keepdims=True))
    fm_second = jnp.sum(jnp.concatenate(terms, axis=1), axis=1, keepdims=True)
    dnn_in = all_e.reshape(x.shape[0], -1)
    h1 = jnp.maximum(dnn_in @ p["w1"] + p["b1"], 0.0)
    h2 = jnp.maximum(h1 @ p["w2"] + p["b2"], 0.0)
    return jnp.concatenate([fm_first + fm_second, h2], axis=1)


def make_params(key):
    ks = jax.random.split(key, 10)
    dnn_in_dim = FEAT_SIZE * EMB
    scale = 0.1
    return {
        # embedding tables: row 0 / row 1, per discrete feature
        "t0": scale * jax.random.normal(ks[0], (NUM_DISCRETE, EMB), jnp.float32),
        "t1": scale * jax.random.normal(ks[1], (NUM_DISCRETE, EMB), jnp.float32),
        # cont_linear: Linear(NC -> NC*E), stored transposed [in, out]
        "cw": scale * jax.random.normal(ks[2], (NUM_CONTINUOUS, NUM_CONTINUOUS * EMB), jnp.float32),
        "cb": scale * jax.random.normal(ks[3], (1, NUM_CONTINUOUS * EMB), jnp.float32),
        # fm_linear: Linear(F -> 1)
        "fmw": scale * jax.random.normal(ks[4], (FEAT_SIZE, 1), jnp.float32),
        "fmb": scale * jax.random.normal(ks[5], (1, 1), jnp.float32),
        # dnn: Linear(F*E -> 64) + ReLU, Linear(64 -> 32) + ReLU
        "w1": scale * jax.random.normal(ks[6], (dnn_in_dim, HIDDEN[0]), jnp.float32),
        "b1": scale * jax.random.normal(ks[7], (1, HIDDEN[0]), jnp.float32),
        "w2": scale * jax.random.normal(ks[8], (HIDDEN[0], HIDDEN[1]), jnp.float32),
        "b2": scale * jax.random.normal(ks[9], (1, HIDDEN[1]), jnp.float32),
    }


if __name__ == "__main__":
    key = jax.random.PRNGKey(0)
    k_disc, k_cont, k_param = jax.random.split(key, 3)

    B = 256
    # discrete features are binary (valid nn.Embedding(2, E) indices), continuous are normal
    disc_x = jax.random.bernoulli(k_disc, 0.5, (B, NUM_DISCRETE)).astype(jnp.float32)
    cont_x = jax.random.normal(k_cont, (B, NUM_CONTINUOUS), jnp.float32)
    x = jnp.concatenate([disc_x, cont_x], axis=1)          # [B, feat_size]

    params = make_params(k_param)
    ref = jax.block_until_ready(deepfm_reference(x, params))

    # f32 path (tight correctness gate). tile_b chooser yields 128 -> grid of 2 steps.
    out = jax.block_until_ready(deepfm_forward(x, params, matmul_dtype=jnp.float32))
    assert out.shape == (B, OUT_DIM), out.shape
    np.testing.assert_allclose(np.asarray(out), np.asarray(ref), rtol=1e-4, atol=1e-4)

    # bf16 I/O + MXU operands, f32 accumulation (v6e/v7x production path).
    out_bf16 = jax.block_until_ready(
        deepfm_forward(x, params, matmul_dtype=jnp.bfloat16, out_dtype=jnp.float32))
    np.testing.assert_allclose(np.asarray(out_bf16), np.asarray(ref), rtol=2e-2, atol=2e-2)

    print("KERNEL_OK")
</pallas_src>

<mosaic_0001>
module attributes {stable_mosaic.version = 11 : i64} {
  func.func @deepfm_kernel(%arg0: i32, %arg1: memref<128x8xf32, #tpu.memory_space<vmem>>, %arg2: memref<8x128xf32, #tpu.memory_space<vmem>>, %arg3: memref<1x128xf32, #tpu.memory_space<vmem>>, %arg4: memref<64x32xf32, #tpu.memory_space<vmem>>, %arg5: memref<1x32xf32, #tpu.memory_space<vmem>>, %arg6: memref<128x33xf32, #tpu.memory_space<vmem>>) attributes {dimension_semantics = [#tpu.dimension_semantics<parallel>], iteration_bounds = array<i64: 2>, scalar_prefetch = 0 : i64, scratch_operands = 0 : i64, tpu.core_type = #tpu.core_type<tc>, window_params = [{transform_indices = @transform_0, window_bounds = array<i64: 128, 8>}, {pipeline_mode = #tpu.pipeline_mode<synchronous>, transform_indices = @transform_1, window_bounds = array<i64: 8, 128>}, {pipeline_mode = #tpu.pipeline_mode<synchronous>, transform_indices = @transform_2, window_bounds = array<i64: 1, 128>}, {pipeline_mode = #tpu.pipeline_mode<synchronous>, transform_indices = @transform_3, window_bounds = array<i64: 64, 32>}, {pipeline_mode = #tpu.pipeline_mode<synchronous>, transform_indices = @transform_4, window_bounds = array<i64: 1, 32>}, {transform_indices = @transform_5, window_bounds = array<i64: 128, 33>}]} {
    %c0 = arith.constant 0 : index
    %c0_0 = arith.constant 0 : index
    %0 = vector.load %arg1[%c0, %c0_0] : memref<128x8xf32, #tpu.memory_space<vmem>>, vector<128x8xf32>
    %c0_1 = arith.constant 0 : index
    %c0_2 = arith.constant 0 : index
    %1 = vector.load %arg2[%c0_1, %c0_2] : memref<8x128xf32, #tpu.memory_space<vmem>>, vector<8x128xf32>
    %cst = arith.constant dense<0.000000e+00> : vector<128x128xf32>
    %2 = tpu.matmul %0, %1, %cst {dimension_numbers = #tpu.dot_dimension_numbers<[1], [0], [0], [1], [0, 0, 1, 1], [], []>} : vector<128x8xf32>, vector<8x128xf32>, vector<128x128xf32> -> vector<128x128xf32>
    %c0_3 = arith.constant 0 : index
    %c0_4 = arith.constant 0 : index
    %3 = vector.load %arg3[%c0_3, %c0_4] : memref<1x128xf32, #tpu.memory_space<vmem>>, vector<1x128xf32>
    %4 = vector.broadcast %3 : vector<1x128xf32> to vector<128x128xf32>
    %5 = arith.addf %2, %4 : vector<128x128xf32>
    %6 = vector.extract_strided_slice %5 {offsets = [0, 0], sizes = [128, 24], strides = [1, 1]} : vector<128x128xf32> to vector<128x24xf32>
    %7 = vector.extract_strided_slice %5 {offsets = [0, 24], sizes = [128, 4], strides = [1, 1]} : vector<128x128xf32> to vector<128x4xf32>
    %8 = vector.extract_strided_slice %5 {offsets = [0, 28], sizes = [128, 1], strides = [1, 1]} : vector<128x128xf32> to vector<128x1xf32>
    %9 = vector.extract_strided_slice %5 {offsets = [0, 32], sizes = [128, 64], strides = [1, 1]} : vector<128x128xf32> to vector<128x64xf32>
    %cst_5 = arith.constant 0.000000e+00 : f32
    %10 = vector.broadcast %cst_5 : f32 to vector<128x64xf32>
    %11 = arith.maximumf %9, %10 : vector<128x64xf32>
    %12 = arith.mulf %7, %7 : vector<128x4xf32>
    %cst_6 = arith.constant dense<0.000000e+00> : vector<128xf32>
    %13 = vector.multi_reduction <add>, %12, %cst_6 [1] : vector<128x4xf32> to vector<128xf32>
    %14 = vector.shape_cast %13 : vector<128xf32> to vector<128x1xf32>
    %15 = arith.mulf %6, %6 : vector<128x24xf32>
    %cst_7 = arith.constant dense<0.000000e+00> : vector<128xf32>
    %16 = vector.multi_reduction <add>, %15, %cst_7 [1] : vector<128x24xf32> to vector<128xf32>
    %17 = vector.shape_cast %16 : vector<128xf32> to vector<128x1xf32>
    %18 = arith.subf %14, %17 : vector<128x1xf32>
    %cst_8 = arith.constant 5.000000e-01 : f32
    %19 = vector.broadcast %cst_8 : f32 to vector<128x1xf32>
    %20 = arith.mulf %19, %18 : vector<128x1xf32>
    %c0_9 = arith.constant 0 : index
    %c0_10 = arith.constant 0 : index
    %21 = vector.load %arg4[%c0_9, %c0_10] : memref<64x32xf32, #tpu.memory_space<vmem>>, vector<64x32xf32>
    %cst_11 = arith.constant dense<0.000000e+00> : vector<128x32xf32>
    %22 = tpu.matmul %11, %21, %cst_11 {dimension_numbers = #tpu.dot_dimension_numbers<[1], [0], [0], [1], [0, 0, 1, 1], [], []>} : vector<128x64xf32>, vector<64x32xf32>, vector<128x32xf32> -> vector<128x32xf32>
    %c0_12 = arith.constant 0 : index
    %c0_13 = arith.constant 0 : index
    %23 = vector.load %arg5[%c0_12, %c0_13] : memref<1x32xf32, #tpu.memory_space<vmem>>, vector<1x32xf32>
    %24 = vector.broadcast %23 : vector<1x32xf32> to vector<128x32xf32>
    %25 = arith.addf %22, %24 : vector<128x32xf32>
    %cst_14 = arith.constant 0.000000e+00 : f32
    %26 = vector.broadcast %cst_14 : f32 to vector<128x32xf32>
    %27 = arith.maximumf %25, %26 : vector<128x32xf32>
    %28 = arith.addf %8, %20 : vector<128x1xf32>
    %29 = tpu.concatenate %28, %27 in 1 : vector<128x1xf32>, vector<128x32xf32> -> vector<128x33xf32>
    %c0_15 = arith.constant 0 : index
    %c0_16 = arith.constant 0 : index
    %30 = vector.load %arg6[%c0_15, %c0_16] : memref<128x33xf32, #tpu.memory_space<vmem>>, vector<128x33xf32>
    tpu.vector_store %arg6[%c0_15, %c0_16], %29 {strides = array<i32>} : memref<128x33xf32, #tpu.memory_space<vmem>>, vector<128x33xf32>,
    return
  }
  func.func @transform_0(%arg0: i32) -> (i32, i32) {
    %c0_i32 = arith.constant 0 : i32
    %c0_i32_0 = arith.constant 0 : i32
    return %arg0, %c0_i32 : i32, i32
  }
  func.func @transform_1(%arg0: i32) -> (i32, i32) {
    %c0_i32 = arith.constant 0 : i32
    %c0_i32_0 = arith.constant 0 : i32
    %c0_i32_1 = arith.constant 0 : i32
    return %c0_i32, %c0_i32_0 : i32, i32
  }
  func.func @transform_2(%arg0: i32) -> (i32, i32) {
    %c0_i32 = arith.constant 0 : i32
    %c0_i32_0 = arith.constant 0 : i32
    %c0_i32_1 = arith.constant 0 : i32
    return %c0_i32, %c0_i32_0 : i32, i32
  }
  func.func @transform_3(%arg0: i32) -> (i32, i32) {
    %c0_i32 = arith.constant 0 : i32
    %c0_i32_0 = arith.constant 0 : i32
    %c0_i32_1 = arith.constant 0 : i32
    return %c0_i32, %c0_i32_0 : i32, i32
  }
  func.func @transform_4(%arg0: i32) -> (i32, i32) {
    %c0_i32 = arith.constant 0 : i32
    %c0_i32_0 = arith.constant 0 : i32
    %c0_i32_1 = arith.constant 0 : i32
    return %c0_i32, %c0_i32_0 : i32, i32
  }
  func.func @transform_5(%arg0: i32) -> (i32, i32) {
    %c0_i32 = arith.constant 0 : i32
    %c0_i32_0 = arith.constant 0 : i32
    return %arg0, %c0_i32 : i32, i32
  }
}

</mosaic_0001>

<bundles_post_ra>
// kernel: tpu_custom_call.1
= control target key start
LH: loop header
LB: loop body
LE: loop exit
PB: predicated region body
PF: predicated region fallthrough
CT: control target
= control target key end

     0   :  { %s1385_s18 = smov 0   ;;  %s1776_s0 = inlined_call_operand.vmem [shape: f32[256,8], index: 0, kind: input, shape index: {}]   ;;  %s1777_s1 = inlined_call_operand.vmem [shape: f32[8,128], index: 1, kind: input, shape index: {}]   ;;  %s1778_s2 = inlined_call_operand.vmem [shape: f32[1,128], index: 2, kind: input, shape index: {}]   ;;  %s1779_s3 = inlined_call_operand.vmem [shape: f32[64,32], index: 3, kind: input, shape index: {}]   ;;  %s1780_s4 = inlined_call_operand.vmem [shape: f32[1,32], index: 4, kind: input, shape index: {}]   ;;  %s1781_s5 = inlined_call_operand.vmem [shape: f32[256,33], index: 5, kind: output, shape index: {}]  }
   0x1 LB: > { %s1163_s19 = sadd.s32 4294967295, %s1349_s18   ;;  %p1167_p0 = scmp.ge.s32.totalorder %s1349_s18, 1  ;;  %s1349_s18 = sphi %s1385_s18, %s15_s18  }
   0x2   : > { %p188_p1 = scmp.lt.s32.totalorder %s1349_s18, 3 }
   0x4   : > { %p189_p2 = pnand %p1167_p0, %p188_p1 }
   0x5   : > { %s1168_s22 = sshll.u32 (!%p189_p2), %s1163_s19, 4  ;;  %s1351_s21 = smov (!%p189_p2), 96  }
   0x6   : > { %192 = sbr.rel (%p189_p2) target bundleno = 770 (0x302), region = 40  ;;  %p217_p3 = scmp.lt.s32.totalorder (!%p189_p2), %s1168_s22, 31 }
   0x7   : > { %s1352_s24 = smov (!%p189_p2), 104   ;;  %s1353_s25 = smov (!%p189_p2), 100  }
   0x8   : > { %s1354_s28 = smov (!%p189_p2), 1  }
   0xb   : > { %v244_v0 = vld [vmem:[%s1777_s1] sm:$0xff]  ;;  %s1783_s22 = smov (!%p217_p3, %s1168_s22), 31  ;;  %vm252_vm0 = vcmask 64512   ;;  %v679_v17 = vld [vmem:[%s1779_s3 + $0x38] sm:$0xff]  ;;  %v678_v18 = vld [vmem:[%s1779_s3 + $0x30] sm:$0xff]  ;;  %vm591_vm1 = vcmask 195584  }
   0xc   : > { %1249 = vmatprep.subr.mxu0 %v244_v0  ;;  %s1169_s23 = sshll.u32 %s1783_s22, 3  ;;  %1315 = vmatprep.subr.mxu1 %v679_v17  ;;  %v677_v19 = vld [vmem:[%s1779_s3 + $0x28] sm:$0xff]  ;;  %v676_v20 = vld [vmem:[%s1779_s3 + $0x20] sm:$0xff]  ;;  %v675_v21 = vld [vmem:[%s1779_s3 + $0x18] sm:$0xff]  ;;  %vm735_vm2 = vcmask 523264   ;;  %vm542_vm3 = vcmask 31744  }
   0xd   : > { %1250 = vmatpush3.msra.mxu0 %v244_v0  ;;  %s1404_s26 = scalar_lea.vmem %s1776_s0, %s1169_s23  ;;  %1323 = vmatpush3.msra.mxu1 %v679_v17  ;;  %v674_v22 = vld [vmem:[%s1779_s3 + $0x10] sm:$0xff]  ;;  %v673_v23 = vld [vmem:[%s1779_s3 + $0x8] sm:$0xff]  ;;  %v672_v24 = vld [vmem:[%s1779_s3] sm:$0xff]  ;;  %vm1073_vm4 = vcmask 7168   ;;  %s1723_s6 = scalar_lea.vmem %s1781_s5, %s1169_s23  ;;  %vm1090_vm5 = vcmask 269312  }
   0xe   : > { %v228_v1 = vld [vmem:[%s1404_s26] sm:$0xff]  ;;  %v229_v2 = vld [vmem:[%s1404_s26 + $0x8] sm:$0xff]  ;;  %v230_v3 = vld [vmem:[%s1404_s26 + $0x10] sm:$0xff]  ;;  %1275 = vmatprep.subr.mxu0 %v679_v17  ;;  %1316 = vmatprep.subr.mxu1 %v678_v18 }
   0xf   : > { %1251 = vmatprep.mubr.msk.f32.mxu0 %vm252_vm0, %v228_v1  ;;  %v231_v4 = vld [vmem:[%s1404_s26 + $0x18] sm:$0xff]  ;;  %v232_v5 = vld [vmem:[%s1404_s26 + $0x20] sm:$0xff]  ;;  %v233_v6 = vld [vmem:[%s1404_s26 + $0x28] sm:$0xff]  ;;  %1324 = vmatpush3.msra.mxu1 %v678_v18 }
  0x10   : > { %1252 = vmatmul.mubr.msk.f32.vlgmr.msra.gmra.mxu0 %vm252_vm0, %v229_v2  ;;  %v234_v7 = vld [vmem:[%s1404_s26 + $0x30] sm:$0xff]  ;;  %v235_v8 = vld [vmem:[%s1404_s26 + $0x38] sm:$0xff]  ;;  %v236_v9 = vld [vmem:[%s1404_s26 + $0x40] sm:$0xff]  ;;  %1317 = vmatprep.subr.mxu1 %v677_v19 }
  0x11   : > { %1254 = vmatprep.mubr.msk.f32.mxu0 %vm252_vm0, %v230_v3  ;;  %v237_v10 = vld [vmem:[%s1404_s26 + $0x48] sm:$0xff]  ;;  %v238_v11 = vld [vmem:[%s1404_s26 + $0x50] sm:$0xff]  ;;  %v239_v12 = vld [vmem:[%s1404_s26 + $0x58] sm:$0xff]  ;;  %1276 = vmatpush3.msra.mxu0 %v679_v17 }
  0x12   : > { %v240_v13 = vld [vmem:[%s1404_s26 + $0x60] sm:$0xff]  ;;  %v241_v14 = vld [vmem:[%s1404_s26 + $0x68] sm:$0xff]  ;;  %v242_v15 = vld [vmem:[%s1404_s26 + $0x70] sm:$0xff]  ;;  %1277 = vmatprep.subr.mxu0 %v678_v18  ;;  %1325 = vmatpush3.msra.mxu1 %v677_v19 }
  0x13   : > { %v243_v16 = vld [vmem:[%s1404_s26 + $0x78] sm:$0xff]  ;;  %1278 = vmatpush3.msra.mxu0 %v678_v18  ;;  %1318 = vmatprep.subr.mxu1 %v676_v20  ;;  %v1172_v28 = vld [vmem:[%s1778_s2] ss:$0 sm:$0xff] }
  0x14   : > { %1255 = vmatmul.mubr.msk.f32.gmra.mxu0 %vm252_vm0, %v231_v4  ;;  %1279 = vmatprep.subr.mxu0 %v677_v19 }
  0x15   : > { %1257 = vmatprep.mubr.msk.f32.mxu0 %vm252_vm0, %v232_v5  ;;  %1280 = vmatpush3.msra.mxu0 %v677_v19 }
  0x16   : > { %1281 = vmatprep.subr.mxu0 %v676_v20  ;;  %1326 = vmatpush3.msra.mxu1 %v676_v20 }
  0x17   : > { %1282 = vmatpush3.msra.mxu0 %v676_v20  ;;  %1319 = vmatprep.subr.mxu1 %v675_v21 }
  0x18   : > { %1258 = vmatmul.mubr.msk.f32.gmra.mxu0 %vm252_vm0, %v233_v6  ;;  %1283 = vmatprep.subr.mxu0 %v675_v21 }
  0x19   : > { %1260 = vmatprep.mubr.msk.f32.mxu0 %vm252_vm0, %v234_v7  ;;  %1327 = vmatpush3.msra.mxu1 %v675_v21 }
  0x1a   : > { %1284 = vmatpush3.msra.mxu0 %v675_v21  ;;  %1320 = vmatprep.subr.mxu1 %v674_v22 }
  0x1b   : > { %1285 = vmatprep.subr.mxu0 %v674_v22  ;;  %1328 = vmatpush3.msra.mxu1 %v674_v22 }
  0x1c   : > { %1261 = vmatmul.mubr.msk.f32.gmra.mxu0 %vm252_vm0, %v235_v8  ;;  %1321 = vmatprep.subr.mxu1 %v673_v23 }
  0x1d   : > { %1263 = vmatprep.mubr.msk.f32.mxu0 %vm252_vm0, %v236_v9  ;;  %1286 = vmatpush3.msra.mxu0 %v674_v22 }
  0x1e   : > { %1287 = vmatprep.subr.mxu0 %v673_v23  ;;  %1329 = vmatpush3.msra.mxu1 %v673_v23 }
  0x1f   : > { %1288 = vmatpush3.msra.mxu0 %v673_v23  ;;  %1322 = vmatprep.subr.mxu1 %v672_v24 }
  0x20   : > { %1264 = vmatmul.mubr.msk.f32.gmra.mxu0 %vm252_vm0, %v237_v10  ;;  %1289 = vmatprep.subr.mxu0 %v672_v24 }
  0x21   : > { %1266 = vmatprep.mubr.msk.f32.mxu0 %vm252_vm0, %v238_v11  ;;  %1330 = vmatpush3.msra.mxu1 %v672_v24 }
  0x22   : > { %1290 = vmatpush3.msra.mxu0 %v672_v24 }
  0x24   : > { %1267 = vmatmul.mubr.msk.f32.gmra.mxu0 %vm252_vm0, %v239_v12 }
  0x25   : > { %1269 = vmatprep.mubr.msk.f32.mxu0 %vm252_vm0, %v240_v13 }
  0x28   : > { %1270 = vmatmul.mubr.msk.f32.gmra.mxu0 %vm252_vm0, %v241_v14 }
  0x29   : > { %1272 = vmatprep.mubr.msk.f32.mxu0 %vm252_vm0, %v242_v15 }
  0x2c   : > { %1273 = vmatmul.mubr.msk.f32.gmra.mxu0 %vm252_vm0, %v243_v16 }
  0xd0   : > { %v1253_v25 = vpop.f32.mrf.mxu0 }
  0xd1   : > { %v1516_v4 = vadd.f32 %v1253_v25, %v1172_v28 }
  0xd2   : > { %v367_v26 = vpop.f32.mrf.mxu0 }
  0xd3   : > { %v1508_v63 = vadd.f32 %v1172_v28, %v367_v26  ;;  %v447_v8 = vmax.f32 %v1516_v4, 0.0  ;;  %v463_v11 = vmul.f32 %v1516_v4, %v1516_v4 }
  0xd4   : > { %v1256_v27 = vpop.f32.mrf.mxu0 }
  0xd5   : > { %v1467_v32 = vadd.f32 %v1256_v27, %v1172_v28  ;;  %v446_v6 = vmax.f32 %v1508_v63, 0.0  ;;  %v462_v10 = vmul.f32 %v1508_v63, %v1508_v63  ;;  %v595_v25 = vsel %vm591_vm1, %v463_v11, 0.0 }
  0xd6   : > { %v377_v29 = vpop.f32.mrf.mxu0 }
  0xd7   : > { %v1465_v30 = vadd.f32 %v1172_v28, %v377_v29  ;;  %v449_v39 = vmax.f32 %v1467_v32, 0.0  ;;  %v465_v13 = vmul.f32 %v1467_v32, %v1467_v32 }
  0xd8   : > { %v1259_v31 = vpop.f32.mrf.mxu0 }
  0xd9   : > { %v1469_v33 = vadd.f32 %v1259_v31, %v1172_v28  ;;  %v448_v34 = vmax.f32 %v1465_v30, 0.0  ;;  %v464_v12 = vmul.f32 %v1465_v30, %v1465_v30  ;;  %v601_v26 = vsel %vm591_vm1, %v465_v13, 0.0 }
  0xda   : > { %v387_v35 = vpop.f32.mrf.mxu0 }
  0xdb   : > { %v1472_v36 = vadd.f32 %v1172_v28, %v387_v35  ;;  %707 = vrot.lane.b32.xlu0 %v448_v34, %s1351_s21  ;;  %v451_v37 = vmax.f32 %v1469_v33, 0.0  ;;  %v467_v15 = vmul.f32 %v1469_v33, %v1469_v33  ;;  %v598_v31 = vsel %vm591_vm1, %v464_v12, 0.0 }
  0xdc   : > { %v1262_v38 = vpop.f32.mrf.mxu0 }
  0xdd   : > { %713 = vrot.lane.b32.xlu1 %v451_v37, %s1351_s21  ;;  %v1478_v41 = vadd.f32 %v1262_v38, %v1172_v28  ;;  %v450_v43 = vmax.f32 %v1472_v36, 0.0  ;;  %v466_v14 = vmul.f32 %v1472_v36, %v1472_v36  ;;  %v607_v27 = vsel %vm591_vm1, %v467_v15, 0.0 }
  0xde   : > { %v397_v40 = vpop.f32.mrf.mxu0 }
  0xdf   : > { %v1480_v42 = vadd.f32 %v1172_v28, %v397_v40  ;;  %709 = vrot.lane.b32.xlu0 %v449_v39, %s1351_s21  ;;  %v453_v49 = vmax.f32 %v1478_v41, 0.0  ;;  %v469_v17 = vmul.f32 %v1478_v41, %v1478_v41  ;;  %v604_v35 = vsel %vm591_vm1, %v466_v14, 0.0 }
  0xe0   : > { %v1265_v44 = vpop.f32.mrf.mxu0 }
  0xe1   : > { %711 = vrot.lane.b32.xlu1 %v450_v43, %s1351_s21  ;;  %v452_v45 = vmax.f32 %v1480_v42, 0.0  ;;  %v1486_v47 = vadd.f32 %v1265_v44, %v1172_v28  ;;  %v468_v16 = vmul.f32 %v1480_v42, %v1480_v42  ;;  %v613_v29 = vsel %vm591_vm1, %v469_v17, 0.0 }
  0xe2   : > { %v407_v46 = vpop.f32.mrf.mxu0 }
  0xe3   : > { %v1488_v48 = vadd.f32 %v1172_v28, %v407_v46  ;;  %715 = vrot.lane.b32.xlu0 %v452_v45, %s1351_s21  ;;  %v455_v55 = vmax.f32 %v1486_v47, 0.0  ;;  %v471_v19 = vmul.f32 %v1486_v47, %v1486_v47  ;;  %v610_v38 = vsel %vm591_vm1, %v468_v16, 0.0 }
  0xe4   : > { %v1268_v50 = vpop.f32.mrf.mxu0 }
  0xe5   : > { %717 = vrot.lane.b32.xlu1 %v453_v49, %s1351_s21  ;;  %v454_v51 = vmax.f32 %v1488_v48, 0.0  ;;  %v1494_v53 = vadd.f32 %v1268_v50, %v1172_v28  ;;  %v470_v18 = vmul.f32 %v1488_v48, %v1488_v48  ;;  %v619_v34 = vsel %vm591_vm1, %v471_v19, 0.0 }
  0xe6   : > { %v417_v52 = vpop.f32.mrf.mxu0 }
  0xe7   : > { %v1496_v54 = vadd.f32 %v1172_v28, %v417_v52  ;;  %719 = vrot.lane.b32.xlu0 %v454_v51, %s1351_s21  ;;  %v457_v61 = vmax.f32 %v1494_v53, 0.0  ;;  %v473_v21 = vmul.f32 %v1494_v53, %v1494_v53  ;;  %v616_v40 = vsel %vm591_vm1, %v470_v18, 0.0 }
  0xe8   : > { %v1271_v56 = vpop.f32.mrf.mxu0 }
  0xe9   : > { %721 = vrot.lane.b32.xlu1 %v455_v55, %s1351_s21  ;;  %v456_v57 = vmax.f32 %v1496_v54, 0.0  ;;  %v1502_v59 = vadd.f32 %v1271_v56, %v1172_v28  ;;  %v472_v20 = vmul.f32 %v1496_v54, %v1496_v54  ;;  %v625_v37 = vsel %vm591_vm1, %v473_v21, 0.0 }
  0xea   : > { %v427_v58 = vpop.f32.mrf.mxu0 }
  0xeb   : > { %v1504_v60 = vadd.f32 %v1172_v28, %v427_v58  ;;  %723 = vrot.lane.b32.xlu0 %v456_v57, %s1351_s21  ;;  %v459_v3 = vmax.f32 %v1502_v59, 0.0  ;;  %v475_v23 = vmul.f32 %v1502_v59, %v1502_v59  ;;  %v622_v46 = vsel %vm591_vm1, %v472_v20, 0.0 }
  0xec   : > { %v1274_v62 = vpop.f32.mrf.mxu0 }
  0xed   : > { %725 = vrot.lane.b32.xlu1 %v457_v61, %s1351_s21  ;;  %v458_v0 = vmax.f32 %v1504_v60, 0.0  ;;  %v1518_v5 = vadd.f32 %v1274_v62, %v1172_v28  ;;  %v474_v22 = vmul.f32 %v1504_v60, %v1504_v60  ;;  %v631_v39 = vsel %vm591_vm1, %v475_v23, 0.0 }
  0xee   : > { %v437_v1 = vpop.f32.mrf.mxu0 }
  0xef   : > { %727 = vrot.lane.b32.xlu0 %v458_v0, %s1351_s21  ;;  %v1513_v2 = vadd.f32 %v1172_v28, %v437_v1  ;;  %v461_v9 = vmax.f32 %v1518_v5, 0.0  ;;  %v477_v24 = vmul.f32 %v1518_v5, %v1518_v5  ;;  %v592_v28 = vsel %vm591_vm1, %v462_v10, 0.0 }
  0xf0   : > { %v628_v51 = vsel %vm591_vm1, %v474_v22, 0.0 }
  0xf1   : > { %729 = vrot.lane.b32.xlu1 %v459_v3, %s1351_s21  ;;  %v460_v7 = vmax.f32 %v1513_v2, 0.0  ;;  %v637_v44 = vsel %vm591_vm1, %v477_v24, 0.0  ;;  %v476_v52 = vmul.f32 %v1513_v2, %v1513_v2 }
  0xf3   : > { %703 = vrot.lane.b32.xlu0 %v446_v6, %s1351_s21  ;;  %v634_v57 = vsel %vm591_vm1, %v476_v52, 0.0 }
  0xf5   : > { %731 = vrot.lane.b32.xlu1 %v460_v7, %s1351_s21 }
  0xf7   : > { %705 = vrot.lane.b32.xlu0 %v447_v8, %s1351_s21 }
  0xf9   : > { %733 = vrot.lane.b32.xlu1 %v461_v9, %s1351_s21 }
  0xfb   : > { %494 = vrot.lane.b32.xlu0 %v462_v10, %s1352_s24 }
  0xfd   : > { %496 = vrot.lane.b32.xlu1 %v463_v11, %s1352_s24 }
  0xff   : > { %498 = vrot.lane.b32.xlu0 %v464_v12, %s1352_s24 }
 0x101   : > { %500 = vrot.lane.b32.xlu1 %v465_v13, %s1352_s24 }
 0x103   : > { %502 = vrot.lane.b32.xlu0 %v466_v14, %s1352_s24 }
 0x105   : > { %504 = vrot.lane.b32.xlu1 %v467_v15, %s1352_s24 }
 0x107   : > { %506 = vrot.lane.b32.xlu0 %v468_v16, %s1352_s24 }
 0x109   : > { %508 = vrot.lane.b32.xlu1 %v469_v17, %s1352_s24 }
 0x10b   : > { %510 = vrot.lane.b32.xlu0 %v470_v18, %s1352_s24 }
 0x10d   : > { %512 = vrot.lane.b32.xlu1 %v471_v19, %s1352_s24 }
 0x10f   : > { %514 = vrot.lane.b32.xlu0 %v472_v20, %s1352_s24 }
 0x111   : > { %516 = vrot.lane.b32.xlu1 %v473_v21, %s1352_s24 }
 0x113   : > { %518 = vrot.lane.b32.xlu0 %v474_v22, %s1352_s24 }
 0x115   : > { %520 = vrot.lane.b32.xlu1 %v475_v23, %s1352_s24 }
 0x119   : > { %524 = vrot.lane.b32.xlu1 %v477_v24, %s1352_s24 }
 0x132   : > { %596 = vadd.xlane.f32.xlu0 %v595_v25 }
 0x136   : > { %602 = vadd.xlane.f32.xlu0 %v601_v26 }
 0x13a   : > { %608 = vadd.xlane.f32.xlu0 %v607_v27 }
 0x13d   : > { %593 = vadd.xlane.f32.xlu1 %v592_v28 }
 0x13e   : > { %614 = vadd.xlane.f32.xlu0 %v613_v29 }
 0x141   : > { %599 = vadd.xlane.f32.xlu1 %v598_v31 }
 0x142   : > { %620 = vadd.xlane.f32.xlu0 %v619_v34 }
 0x145   : > { %605 = vadd.xlane.f32.xlu1 %v604_v35 }
 0x146   : > { %626 = vadd.xlane.f32.xlu0 %v625_v37 }
 0x149   : > { %611 = vadd.xlane.f32.xlu1 %v610_v38 }
 0x14a   : > { %632 = vadd.xlane.f32.xlu0 %v631_v39 }
 0x14d   : > { %v708_v43 = vpop.permute.xlu0 %707  ;;  %617 = vadd.xlane.f32.xlu1 %v616_v40 }
 0x14e   : > { %1294 = vmatprep.mubr.msk.f32.mxu1 %vm735_vm2, %v708_v43  ;;  %638 = vadd.xlane.f32.xlu0 %v637_v44 }
 0x14f   : > { %v714_v45 = vpop.permute.xlu1 %713 }
 0x151   : > { %v710_v49 = vpop.permute.xlu0 %709  ;;  %623 = vadd.xlane.f32.xlu1 %v622_v46 }
 0x152   : > { %1295 = vmatmul.mubr.msk.f32.vlgmr.msra.gmra.mxu1 %vm735_vm2, %v710_v49 }
 0x153   : > { %v712_v50 = vpop.permute.xlu1 %711 }
 0x154   : > { %1297 = vmatprep.mubr.msk.f32.mxu1 %vm735_vm2, %v712_v50 }
 0x155   : > { %v716_v55 = vpop.permute.xlu0 %715  ;;  %629 = vadd.xlane.f32.xlu1 %v628_v51 }
 0x156   : > { %1298 = vmatmul.mubr.msk.f32.gmra.mxu1 %vm735_vm2, %v714_v45 }
 0x157   : > { %v718_v56 = vpop.permute.xlu1 %717  ;;  %1300 = vmatprep.mubr.msk.f32.mxu1 %vm735_vm2, %v716_v55 }
 0x159   : > { %v720_v58 = vpop.permute.xlu0 %719  ;;  %635 = vadd.xlane.f32.xlu1 %v634_v57 }
 0x15a   : > { %1301 = vmatmul.mubr.msk.f32.gmra.mxu1 %vm735_vm2, %v718_v56 }
 0x15b   : > { %v722_v61 = vpop.permute.xlu1 %721  ;;  %1303 = vmatprep.mubr.msk.f32.mxu1 %vm735_vm2, %v720_v58 }
 0x15d   : > { %v724_v62 = vpop.permute.xlu0 %723 }
 0x15e   : > { %1304 = vmatmul.mubr.msk.f32.gmra.mxu1 %vm735_vm2, %v722_v61 }
 0x15f   : > { %v726_v0 = vpop.permute.xlu1 %725  ;;  %1306 = vmatprep.mubr.msk.f32.mxu1 %vm735_vm2, %v724_v62 }
 0x161   : > { %v728_v1 = vpop.permute.xlu0 %727 }
 0x162   : > { %1307 = vmatmul.mubr.msk.f32.gmra.mxu1 %vm735_vm2, %v726_v0 }
 0x163   : > { %v730_v3 = vpop.permute.xlu1 %729  ;;  %1309 = vmatprep.mubr.msk.f32.mxu1 %vm735_vm2, %v728_v1 }
 0x164   : > { %522 = vrot.lane.b32.xlu0 %v476_v52, %s1352_s24 }
 0x165   : > { %v704_v6 = vpop.permute.xlu0 %703 }
 0x166   : > { %1291 = vmatprep.mubr.msk.f32.mxu0 %vm735_vm2, %v704_v6  ;;  %1310 = vmatmul.mubr.msk.f32.gmra.mxu1 %vm735_vm2, %v730_v3 }
 0x167   : > { %v732_v7 = vpop.permute.xlu1 %731 }
 0x168   : > { %1312 = vmatprep.mubr.msk.f32.mxu1 %vm735_vm2, %v732_v7 }
 0x169   : > { %v706_v8 = vpop.permute.xlu0 %705 }
 0x16a   : > { %1292 = vmatmul.mubr.msk.f32.vlgmr.msra.gmra.mxu0 %vm735_vm2, %v706_v8 }
 0x16b   : > { %v734_v9 = vpop.permute.xlu1 %733 }
 0x16c   : > { %1313 = vmatmul.mubr.msk.f32.gmra.mxu1 %vm735_vm2, %v734_v9 }
 0x16d   : > { %v495_v10 = vpop.permute.xlu0 %494 }
 0x16e   : > { %v543_v23 = vsel %vm542_vm3, %v495_v10, 0.0 }
 0x16f   : > { %v497_v11 = vpop.permute.xlu1 %496 }
 0x170   : > { %v546_v12 = vsel %vm542_vm3, %v497_v11, 0.0 }
 0x171   : > { %547 = vadd.xlane.f32.xlu1 %v546_v12  ;;  %v499_v13 = vpop.permute.xlu0 %498 }
 0x172   : > { %v549_v29 = vsel %vm542_vm3, %v499_v13, 0.0 }
 0x173   : > { %v501_v18 = vpop.permute.xlu1 %500 }
 0x174   : > { %v552_v26 = vsel %vm542_vm3, %v501_v18, 0.0 }
 0x175   : > { %v503_v14 = vpop.permute.xlu0 %502 }
 0x176   : > { %v555_v15 = vsel %vm542_vm3, %v503_v14, 0.0 }
 0x177   : > { %556 = vadd.xlane.f32.xlu1 %v555_v15  ;;  %v505_v21 = vpop.permute.xlu1 %504 }
 0x178   : > { %v558_v34 = vsel %vm542_vm3, %v505_v21, 0.0 }
 0x179   : > { %v507_v16 = vpop.permute.xlu0 %506 }
 0x17a   : > { %v561_v17 = vsel %vm542_vm3, %v507_v16, 0.0 }
 0x17b   : > { %562 = vadd.xlane.f32.xlu1 %v561_v17  ;;  %v509_v28 = vpop.permute.xlu1 %508 }
 0x17c   : > { %v564_v35 = vsel %vm542_vm3, %v509_v28, 0.0 }
 0x17d   : > { %v511_v19 = vpop.permute.xlu0 %510 }
 0x17e   : > { %v567_v20 = vsel %vm542_vm3, %v511_v19, 0.0 }
 0x17f   : > { %568 = vadd.xlane.f32.xlu1 %v567_v20  ;;  %v513_v31 = vpop.permute.xlu1 %512 }
 0x180   : > { %v570_v38 = vsel %vm542_vm3, %v513_v31, 0.0 }
 0x181   : > { %v515_v22 = vpop.permute.xlu0 %514 }
 0x182   : > { %v573_v24 = vsel %vm542_vm3, %v515_v22, 0.0 }
 0x183   : > { %544 = vadd.xlane.f32.xlu0 %v543_v23  ;;  %574 = vadd.xlane.f32.xlu1 %v573_v24  ;;  %v517_v37 = vpop.permute.xlu1 %516 }
 0x184   : > { %v576_v40 = vsel %vm542_vm3, %v517_v37, 0.0 }
 0x185   : > { %v519_v25 = vpop.permute.xlu0 %518 }
 0x186   : > { %v579_v27 = vsel %vm542_vm3, %v519_v25, 0.0 }
 0x187   : > { %553 = vadd.xlane.f32.xlu0 %v552_v26  ;;  %580 = vadd.xlane.f32.xlu1 %v579_v27  ;;  %v521_v39 = vpop.permute.xlu1 %520 }
 0x188   : > { %v582_v44 = vsel %vm542_vm3, %v521_v39, 0.0 }
 0x18b   : > { %550 = vadd.xlane.f32.xlu0 %v549_v29  ;;  %v525_v43 = vpop.permute.xlu1 %524 }
 0x18c   : > { %v588_v45 = vsel %vm542_vm3, %v525_v43, 0.0 }
 0x18f   : > { %559 = vadd.xlane.f32.xlu0 %v558_v34 }
 0x193   : > { %565 = vadd.xlane.f32.xlu0 %v564_v35 }
 0x197   : > { %571 = vadd.xlane.f32.xlu0 %v570_v38 }
 0x19b   : > { %577 = vadd.xlane.f32.xlu0 %v576_v40 }
 0x19f   : > { %583 = vadd.xlane.f32.xlu0 %v582_v44 }
 0x1a3   : > { %589 = vadd.xlane.f32.xlu0 %v588_v45 }
 0x1bb   : > { %v597_v46 = vpop.xlane.xlu0 %596 }
 0x1bf   : > { %v603_v49 = vpop.xlane.xlu0 %602 }
 0x1c3   : > { %v1624_v50 = vpop.xlane.xlu0 %608 }
 0x1c6   : > { %v594_v55 = vpop.xlane.xlu1 %593 }
 0x1c7   : > { %v1626_v51 = vpop.xlane.xlu0 %614 }
 0x1ca   : > { %v600_v57 = vpop.xlane.xlu1 %599 }
 0x1cb   : > { %v1628_v52 = vpop.xlane.xlu0 %620 }
 0x1ce   : > { %v606_v62 = vpop.xlane.xlu1 %605 }
 0x1cf   : > { %v1630_v56 = vpop.xlane.xlu0 %626 }
 0x1d2   : > { %v612_v3 = vpop.xlane.xlu1 %611 }
 0x1d3   : > { %v1632_v58 = vpop.xlane.xlu0 %632 }
 0x1d6   : > { %v618_v6 = vpop.xlane.xlu1 %617 }
 0x1d7   : > { %v1634_v61 = vpop.xlane.xlu0 %638 }
 0x1da   : > { %v624_v7 = vpop.xlane.xlu1 %623 }
 0x1db   : > { %v523_v0 = vpop.permute.xlu0 %522 }
 0x1dc   : > { %v585_v1 = vsel %vm542_vm3, %v523_v0, 0.0 }
 0x1dd   : > { %586 = vadd.xlane.f32.xlu1 %v585_v1 }
 0x1de   : > { %v630_v8 = vpop.xlane.xlu1 %629 }
 0x1e2   : > { %v1637_v9 = vpop.xlane.xlu1 %635 }
 0x1fa   : > { %v548_v10 = vpop.xlane.xlu1 %547 }
 0x1fb   : > { %v641_v11 = vsub.f32 %v548_v10, %v597_v46 }
 0x1fd   : > { %v657_v12 = vmul.f32 0.5, %v641_v11 }
 0x1ff   : > { %v930_v13 = vadd.f32 %v657_v12, %v1516_v4 }
 0x200   : > { %v557_v14 = vpop.xlane.xlu1 %556 }
 0x201   : > { %v644_v15 = vsub.f32 %v557_v14, %v606_v62  ;;  %963 = vrot.lane.b32.xlu0 %v930_v13, %s1353_s25 }
 0x203   : > { %v660_v16 = vmul.f32 0.5, %v644_v15 }
 0x204   : > { %v563_v17 = vpop.xlane.xlu1 %562 }
 0x205   : > { %v933_v18 = vadd.f32 %v660_v16, %v1472_v36  ;;  %v646_v19 = vsub.f32 %v563_v17, %v612_v3 }
 0x207   : > { %v662_v20 = vmul.f32 0.5, %v646_v19  ;;  %969 = vrot.lane.b32.xlu0 %v933_v18, %s1353_s25 }
 0x208   : > { %v569_v21 = vpop.xlane.xlu1 %568 }
 0x209   : > { %v935_v22 = vadd.f32 %v662_v20, %v1480_v42  ;;  %v648_v23 = vsub.f32 %v569_v21, %v618_v6 }
 0x20b   : > { %v664_v24 = vmul.f32 0.5, %v648_v23  ;;  %973 = vrot.lane.b32.xlu0 %v935_v22, %s1353_s25 }
 0x20c   : > { %v575_v4 = vpop.xlane.xlu1 %574  ;;  %v545_v25 = vpop.xlane.xlu0 %544 }
 0x20d   : > { %v937_v26 = vadd.f32 %v664_v24, %v1488_v48  ;;  %v650_v27 = vsub.f32 %v575_v4, %v624_v7  ;;  %v640_v28 = vsub.f32 %v545_v25, %v594_v55 }
 0x20f   : > { %v666_v29 = vmul.f32 0.5, %v650_v27  ;;  %v656_v31 = vmul.f32 0.5, %v640_v28  ;;  %977 = vrot.lane.b32.xlu0 %v937_v26, %s1353_s25 }
 0x210   : > { %v581_v36 = vpop.xlane.xlu1 %580  ;;  %v554_v34 = vpop.xlane.xlu0 %553 }
 0x211   : > { %v939_v35 = vadd.f32 %v666_v29, %v1496_v54  ;;  %v929_v42 = vadd.f32 %v656_v31, %v1508_v63  ;;  %v652_v37 = vsub.f32 %v581_v36, %v630_v8  ;;  %v643_v38 = vsub.f32 %v554_v34, %v603_v49 }
 0x212   : > { %v1296_v55 = vpop.f32.mrf.mxu1 }
 0x213   : > { %v668_v39 = vmul.f32 0.5, %v652_v37  ;;  %v659_v40 = vmul.f32 0.5, %v643_v38  ;;  %981 = vrot.lane.b32.xlu0 %v939_v35, %s1353_s25  ;;  %961 = vrot.lane.b32.xlu1 %v929_v42, %s1353_s25 }
 0x214   : > { %v551_v48 = vpop.xlane.xlu0 %550 }
 0x215   : > { %v941_v43 = vadd.f32 %v668_v39, %v1504_v60  ;;  %v932_v44 = vadd.f32 %v659_v40, %v1467_v32  ;;  %v642_v45 = vsub.f32 %v551_v48, %v600_v57  ;;  %v1660_v57 = vpop.f32.mrf.mxu1 }
 0x217   : > { %985 = vrot.lane.b32.xlu0 %v941_v43, %s1353_s25  ;;  %967 = vrot.lane.b32.xlu1 %v932_v44, %s1353_s25  ;;  %v658_v54 = vmul.f32 0.5, %v642_v45 }
 0x218   : > { %v560_v63 = vpop.xlane.xlu0 %559 }
 0x219   : > { %v645_v46 = vsub.f32 %v560_v63, %v1624_v50  ;;  %v931_v49 = vadd.f32 %v658_v54, %v1465_v30  ;;  %v1299_v30 = vpop.f32.mrf.mxu1 }
 0x21b   : > { %v661_v62 = vmul.f32 0.5, %v645_v46  ;;  %965 = vrot.lane.b32.xlu1 %v931_v49, %s1353_s25 }
 0x21c   : > { %v566_v0 = vpop.xlane.xlu0 %565 }
 0x21d   : > { %v934_v60 = vadd.f32 %v661_v62, %v1469_v33  ;;  %v647_v32 = vsub.f32 %v566_v0, %v1626_v51  ;;  %v854_v51 = vpop.f32.mrf.mxu1 }
 0x21f   : > { %v663_v1 = vmul.f32 0.5, %v647_v32  ;;  %971 = vrot.lane.b32.xlu1 %v934_v60, %s1353_s25  ;;  %v1302_v14 = vpop.f32.mrf.mxu1 }
 0x220   : > { %v572_v3 = vpop.xlane.xlu0 %571 }
 0x221   : > { %v936_v6 = vadd.f32 %v663_v1, %v1478_v41  ;;  %v649_v50 = vsub.f32 %v572_v3, %v1628_v52  ;;  %v864_v17 = vpop.f32.mrf.mxu1 }
 0x223   : > { %v665_v7 = vmul.f32 0.5, %v649_v50  ;;  %975 = vrot.lane.b32.xlu1 %v936_v6, %s1353_s25  ;;  %v1305_v20 = vpop.f32.mrf.mxu1 }
 0x224   : > { %v578_v8 = vpop.xlane.xlu0 %577 }
 0x225   : > { %v938_v10 = vadd.f32 %v665_v7, %v1486_v47  ;;  %v651_v33 = vsub.f32 %v578_v8, %v1630_v56  ;;  %v874_v21 = vpop.f32.mrf.mxu1 }
 0x227   : > { %v667_v11 = vmul.f32 0.5, %v651_v33  ;;  %979 = vrot.lane.b32.xlu1 %v938_v10, %s1353_s25  ;;  %v1308_v24 = vpop.f32.mrf.mxu1 }
 0x228   : > { %v584_v12 = vpop.xlane.xlu0 %583 }
 0x229   : > { %v940_v13 = vadd.f32 %v667_v11, %v1494_v53  ;;  %v653_v41 = vsub.f32 %v584_v12, %v1632_v58  ;;  %v1678_v53 = vld [vmem:[%s1780_s4] ss:$0 sm:$0xff]  ;;  %v884_v25 = vpop.f32.mrf.mxu1 }
 0x22a   : > { %v1293_v56 = vpop.f32.mrf.mxu0  ;;  %v860_v23 = vadd.f32 %v1299_v30, %v1678_v53  ;;  %v880_v27 = vadd.f32 %v1305_v20, %v1678_v53  ;;  %v890_v31 = vadd.f32 %v1308_v24, %v1678_v53  ;;  %v845_v63 = vadd.f32 %v1678_v53, %v1660_v57 }
 0x22b   : > { %v669_v52 = vmul.f32 0.5, %v653_v41  ;;  %983 = vrot.lane.b32.xlu1 %v940_v13, %s1353_s25  ;;  %v840_v19 = vadd.f32 %v1293_v56, %v1678_v53  ;;  %v1311_v28 = vpop.f32.mrf.mxu1  ;;  %v865_v62 = vadd.f32 %v1678_v53, %v864_v17  ;;  %v885_v32 = vadd.f32 %v1678_v53, %v884_v25 }
 0x22c   : > { %v590_v15 = vpop.xlane.xlu0 %589  ;;  %v918_v4 = vmax.f32 %v860_v23, 0.0  ;;  %v922_v29 = vmax.f32 %v880_v27, 0.0  ;;  %v924_v35 = vmax.f32 %v890_v31, 0.0  ;;  %v900_v42 = vadd.f32 %v1311_v28, %v1678_v53  ;;  %v834_v43 = vpop.f32.mrf.mxu0 }
 0x22d   : > { %v942_v16 = vadd.f32 %v669_v52, %v1502_v59  ;;  %v655_v47 = vsub.f32 %v590_v15, %v1634_v61  ;;  %v850_v59 = vadd.f32 %v1296_v55, %v1678_v53  ;;  %v914_v61 = vmax.f32 %v840_v19, 0.0  ;;  %v894_v36 = vpop.f32.mrf.mxu1 }
 0x22e   : > { %v926_v38 = vmax.f32 %v900_v42, 0.0  ;;  %v835_v45 = vadd.f32 %v1678_v53, %v834_v43  ;;  %v915_v49 = vmax.f32 %v845_v63, 0.0  ;;  %v855_v55 = vadd.f32 %v1678_v53, %v854_v51 }
 0x22f   : > { %v671_v18 = vmul.f32 0.5, %v655_v47  ;;  %987 = vrot.lane.b32.xlu1 %v942_v16, %s1353_s25  ;;  %v916_v22 = vmax.f32 %v850_v59, 0.0  ;;  %v1314_v34 = vpop.f32.mrf.mxu1  ;;  %v919_v0 = vmax.f32 %v865_v62, 0.0  ;;  %v923_v57 = vmax.f32 %v885_v32, 0.0 }
 0x230   : > { %v910_v37 = vadd.f32 %v1314_v34, %v1678_v53  ;;  %v913_v46 = vmax.f32 %v835_v45, 0.0  ;;  %v895_v1 = vadd.f32 %v1678_v53, %v894_v36 }
 0x231   : > { %v944_v58 = vadd.f32 %v671_v18, %v1518_v5  ;;  %v870_v5 = vadd.f32 %v1302_v14, %v1678_v53  ;;  %v904_v3 = vpop.f32.mrf.mxu1 }
 0x232   : > { %v928_v39 = vmax.f32 %v910_v37, 0.0  ;;  %v925_v50 = vmax.f32 %v895_v1, 0.0  ;;  %v905_v30 = vadd.f32 %v1678_v53, %v904_v3 }
 0x233   : > { %991 = vrot.lane.b32.xlu1 %v944_v58, %s1353_s25  ;;  %v920_v26 = vmax.f32 %v870_v5, 0.0 }
 0x234   : > { %v927_v8 = vmax.f32 %v905_v30, 0.0 }
 0x237   : > { %1027 = vrot.lane.b32.xlu1 %v914_v61, %s1354_s28 }
 0x23b   : > { %1031 = vrot.lane.b32.xlu1 %v916_v22, %s1354_s28 }
 0x23f   : > { %1035 = vrot.lane.b32.xlu1 %v918_v4, %s1354_s28 }
 0x243   : > { %1039 = vrot.lane.b32.xlu1 %v920_v26, %s1354_s28 }
 0x247   : > { %1043 = vrot.lane.b32.xlu1 %v922_v29, %s1354_s28 }
 0x24b   : > { %1047 = vrot.lane.b32.xlu1 %v924_v35, %s1354_s28 }
 0x24f   : > { %1051 = vrot.lane.b32.xlu1 %v926_v38, %s1354_s28 }
 0x253   : > { %1055 = vrot.lane.b32.xlu1 %v928_v39, %s1354_s28 }
 0x266   : > { %v587_v40 = vpop.xlane.xlu1 %586 }
 0x267   : > { %v654_v48 = vsub.f32 %v587_v40, %v1637_v9  ;;  %v917_v9 = vmax.f32 %v855_v55, 0.0 }
 0x269   : > { %v670_v44 = vmul.f32 0.5, %v654_v48 }
 0x26b   : > { %v943_v54 = vadd.f32 %v670_v44, %v1513_v2  ;;  %v875_v2 = vadd.f32 %v1678_v53, %v874_v21 }
 0x26d   : > { %989 = vrot.lane.b32.xlu0 %v943_v54, %s1353_s25  ;;  %v921_v60 = vmax.f32 %v875_v2, 0.0 }
 0x271   : > { %1025 = vrot.lane.b32.xlu0 %v913_v46, %s1354_s28 }
 0x273   : > { %v964_v14 = vpop.permute.xlu0 %963 }
 0x275   : > { %1029 = vrot.lane.b32.xlu0 %v915_v49, %s1354_s28 }
 0x279   : > { %1033 = vrot.lane.b32.xlu0 %v917_v9, %s1354_s28  ;;  %v970_v21 = vpop.permute.xlu0 %969 }
 0x27d   : > { %1037 = vrot.lane.b32.xlu0 %v919_v0, %s1354_s28  ;;  %v974_v4 = vpop.permute.xlu0 %973 }
 0x281   : > { %1041 = vrot.lane.b32.xlu0 %v921_v60, %s1354_s28  ;;  %v978_v5 = vpop.permute.xlu0 %977 }
 0x285   : > { %1045 = vrot.lane.b32.xlu0 %v923_v57, %s1354_s28  ;;  %v962_v6 = vpop.permute.xlu1 %961  ;;  %v982_v25 = vpop.permute.xlu0 %981 }
 0x289   : > { %1049 = vrot.lane.b32.xlu0 %v925_v50, %s1354_s28  ;;  %v968_v7 = vpop.permute.xlu1 %967  ;;  %v986_v26 = vpop.permute.xlu0 %985 }
 0x28d   : > { %1053 = vrot.lane.b32.xlu0 %v927_v8, %s1354_s28  ;;  %v966_v10 = vpop.permute.xlu1 %965 }
 0x291   : > { %v972_v33 = vpop.permute.xlu1 %971 }
 0x295   : > { %v976_v51 = vpop.permute.xlu1 %975 }
 0x299   : > { %v980_v11 = vpop.permute.xlu1 %979 }
 0x29d   : > { %v984_v12 = vpop.permute.xlu1 %983 }
 0x2a1   : > { %v988_v13 = vpop.permute.xlu1 %987 }
 0x2a5   : > { %v992_v41 = vpop.permute.xlu1 %991 }
 0x2a9   : > { %v1028_v52 = vpop.permute.xlu1 %1027 }
 0x2aa   : > { %v1075_v15 = vsel %vm1073_vm4, %v964_v14, %v1028_v52 }
 0x2ab   : > { %1092 = vst.msk [vmem:[%s1723_s6 + $0x8] sm:$0xff] %vm1090_vm5, %v1075_v15 }
 0x2ad   : > { %v1032_v16 = vpop.permute.xlu1 %1031 }
 0x2ae   : > { %v1077_v47 = vsel %vm1073_vm4, %v968_v7, %v1032_v16 }
 0x2af   : > { %1094 = vst.msk [vmem:[%s1723_s6 + $0x18] sm:$0xff] %vm1090_vm5, %v1077_v47 }
 0x2b1   : > { %v1036_v17 = vpop.permute.xlu1 %1035 }
 0x2b2   : > { %v1079_v56 = vsel %vm1073_vm4, %v972_v33, %v1036_v17 }
 0x2b3   : > { %1096 = vst.msk [vmem:[%s1723_s6 + $0x28] sm:$0xff] %vm1090_vm5, %v1079_v56 }
 0x2b5   : > { %v1040_v18 = vpop.permute.xlu1 %1039 }
 0x2b6   : > { %v1081_v53 = vsel %vm1073_vm4, %v976_v51, %v1040_v18 }
 0x2b7   : > { %1098 = vst.msk [vmem:[%s1723_s6 + $0x38] sm:$0xff] %vm1090_vm5, %v1081_v53 }
 0x2b9   : > { %v1044_v58 = vpop.permute.xlu1 %1043 }
 0x2ba   : > { %v1083_v19 = vsel %vm1073_vm4, %v980_v11, %v1044_v58 }
 0x2bb   : > { %1100 = vst.msk [vmem:[%s1723_s6 + $0x48] sm:$0xff] %vm1090_vm5, %v1083_v19 }
 0x2bd   : > { %v1048_v20 = vpop.permute.xlu1 %1047 }
 0x2be   : > { %v1085_v59 = vsel %vm1073_vm4, %v984_v12, %v1048_v20 }
 0x2bf   : > { %1102 = vst.msk [vmem:[%s1723_s6 + $0x58] sm:$0xff] %vm1090_vm5, %v1085_v59 }
 0x2c1   : > { %v1052_v61 = vpop.permute.xlu1 %1051 }
 0x2c2   : > { %v1087_v22 = vsel %vm1073_vm4, %v988_v13, %v1052_v61 }
 0x2c3   : > { %1104 = vst.msk [vmem:[%s1723_s6 + $0x68] sm:$0xff] %vm1090_vm5, %v1087_v22 }
 0x2c5   : > { %v1056_v23 = vpop.permute.xlu1 %1055 }
 0x2c6   : > { %v1089_v24 = vsel %vm1073_vm4, %v992_v41, %v1056_v23 }
 0x2c7   : > { %1106 = vst.msk [vmem:[%s1723_s6 + $0x78] sm:$0xff] %vm1090_vm5, %v1089_v24 }
 0x2df   : > { %v990_v27 = vpop.permute.xlu0 %989 }
 0x2e3   : > { %v1026_v28 = vpop.permute.xlu0 %1025 }
 0x2e4   : > { %v1074_v29 = vsel %vm1073_vm4, %v962_v6, %v1026_v28 }
 0x2e5   : > { %1091 = vst.msk [vmem:[%s1723_s6] sm:$0xff] %vm1090_vm5, %v1074_v29 }
 0x2e7   : > { %v1030_v31 = vpop.permute.xlu0 %1029 }
 0x2e8   : > { %v1076_v36 = vsel %vm1073_vm4, %v966_v10, %v1030_v31 }
 0x2e9   : > { %1093 = vst.msk [vmem:[%s1723_s6 + $0x10] sm:$0xff] %vm1090_vm5, %v1076_v36 }
 0x2eb   : > { %v1034_v34 = vpop.permute.xlu0 %1033 }
 0x2ec   : > { %v1078_v35 = vsel %vm1073_vm4, %v970_v21, %v1034_v34 }
 0x2ed   : > { %1095 = vst.msk [vmem:[%s1723_s6 + $0x20] sm:$0xff] %vm1090_vm5, %v1078_v35 }
 0x2ef   : > { %v1038_v42 = vpop.permute.xlu0 %1037 }
 0x2f0   : > { %v1080_v37 = vsel %vm1073_vm4, %v974_v4, %v1038_v42 }
 0x2f1   : > { %1097 = vst.msk [vmem:[%s1723_s6 + $0x30] sm:$0xff] %vm1090_vm5, %v1080_v37 }
 0x2f3   : > { %v1042_v38 = vpop.permute.xlu0 %1041 }
 0x2f4   : > { %v1082_v39 = vsel %vm1073_vm4, %v978_v5, %v1042_v38 }
 0x2f5   : > { %1099 = vst.msk [vmem:[%s1723_s6 + $0x40] sm:$0xff] %vm1090_vm5, %v1082_v39 }
 0x2f7   : > { %v1046_v40 = vpop.permute.xlu0 %1045 }
 0x2f8   : > { %v1084_v48 = vsel %vm1073_vm4, %v982_v25, %v1046_v40 }
 0x2f9   : > { %1101 = vst.msk [vmem:[%s1723_s6 + $0x50] sm:$0xff] %vm1090_vm5, %v1084_v48 }
 0x2fb   : > { %v1050_v43 = vpop.permute.xlu0 %1049 }
 0x2fc   : > { %v1086_v44 = vsel %vm1073_vm4, %v986_v26, %v1050_v43 }
 0x2fd   : > { %1103 = vst.msk [vmem:[%s1723_s6 + $0x60] sm:$0xff] %vm1090_vm5, %v1086_v44 }
 0x2ff   : > { %v1054_v45 = vpop.permute.xlu0 %1053 }
 0x300   : > { %v1088_v54 = vsel %vm1073_vm4, %v990_v27, %v1054_v45 }
 0x301   : > { %1105 = vst.msk [vmem:[%s1723_s6 + $0x70] sm:$0xff] %vm1090_vm5, %v1088_v54 }
 0x302 PF: > { %s15_s18 = sadd.s32 1, %s1349_s18  }
 0x303   : > { %p12_p4 = scmp.ge.s32.totalorder %s15_s18, 4  }
 0x305   :  { %14 = sbr.rel (!%p12_p4) target bundleno = 1 (0x1), region = 70 }

</bundles_post_ra>
